<compile_context>
chip_gen: v7x
topology: tpu7x:2x2x1
jax: 0.10.0
libtpu: 0.0.40
codegen_flags: <defaults>
</compile_context>

<pallas_src>
import jax
import jax.numpy as jnp
from jax.experimental import pallas as pl
from jax.experimental.pallas import tpu as pltpu


def _attention_kernel(x_ref, a_ref, o_ref):
    # x_ref: (Bt, T, H) batch block (native dtype), a_ref: (1, H) f32,
    # o_ref: (Bt, H)
    x = x_ref[...]                                # native dtype; promotion
    a = a_ref[...]                                # (1, H) float32

    # scores[b, t] = <x[b, t, :], a>  -- lane reduction over H with keepdims,
    # keeping the (T=sublane, H=lane) layout (no relayout to a lane-major
    # (Bt, T) array).  x promotes to f32 element-wise against the f32 a.
    s = jnp.sum(x * a[None, :, :], axis=-1, keepdims=True)      # (Bt, T, 1) f32

    # Numerically stable softmax over time (sublane reductions over axis=1).
    m = jnp.max(s, axis=1, keepdims=True)                        # (Bt, 1, 1)
    e = jnp.exp(s - m)                                           # (Bt, T, 1)
    denom = jnp.sum(e, axis=1, keepdims=True)                    # (Bt, 1, 1)

    # Weighted sum over T as a VPU multiply + sublane reduction, accumulated
    # in f32; the softmax divide is deferred to the (Bt, H) result (exact
    # division to hold the 1e-5 tolerance).
    acc = jnp.sum(e * x, axis=1)                                 # (Bt, H) f32
    o_ref[...] = (acc / denom[:, 0, :]).astype(o_ref.dtype)


def _round_up(v, m):
    return ((v + m - 1) // m) * m


def _pick_block_b(B, T, H, dtype):
    """Batch-block size from the *padded* per-row VMEM footprint."""
    itemsize = jnp.dtype(dtype).itemsize
    sublane = {4: 8, 2: 16, 1: 32}.get(itemsize, 8)
    lanes = _round_up(H, 128)

    # Per-row padded footprint: 2 double-buffered input blocks (native dtype),
    # ~2 f32-block-sized softmax/score temporaries, and double-buffered f32
    # output rows.
    padded_row_in = _round_up(T, sublane) * lanes * itemsize
    padded_row_f32 = _round_up(T, 8) * lanes * 4
    per_row = 2 * padded_row_in + 2 * padded_row_f32 + 2 * lanes * 4

    budget = 28 * 1024 * 1024          # well under the 48 MiB scoped limit we
    rows = budget // max(per_row, 1)   # request, and under v7x's 64 MiB VMEM
    rows = max(8, min(rows, 1024))
    rows = (rows // 8) * 8             # sublane-aligned batch block

    if rows >= B:
        if B >= 16:
            # Split into two blocks so both TensorCores (v7x megacore) get
            # work and the DMA pipeline has something to overlap.
            return _round_up(-(-B // 2), 8)
        return B                       # tiny batch: single full block
    return rows


def attention_forward(x, attention_vec, block_b=None):
    """x: (B, T, H), attention_vec: (H, 1) -> (B, H)."""
    B, T, H = x.shape
    itemsize = jnp.dtype(x.dtype).itemsize
    if block_b is None:
        block_b = _pick_block_b(B, T, H, x.dtype)
    block_b = int(min(block_b, B))

    grid_b = (B + block_b - 1) // block_b      # ragged last block, no padding

    # Attention vector stays in float32 (negligible DMA; keeps score math
    # bit-closer to the f32 PyTorch reference when x is bf16).
    a_row = attention_vec.reshape(1, H).astype(jnp.float32)

    cost = pl.CostEstimate(
        flops=4 * B * T * H,                 # score mul+add, weighted mul+add
        transcendentals=B * T,               # exp
        bytes_accessed=B * T * H * itemsize + B * H * itemsize + H * 4,
    )

    out = pl.pallas_call(
        _attention_kernel,
        out_shape=jax.ShapeDtypeStruct((B, H), x.dtype),
        grid_spec=pltpu.PrefetchScalarGridSpec(
            num_scalar_prefetch=0,
            grid=(grid_b,),
            in_specs=[
                pl.BlockSpec((block_b, T, H), lambda b: (b, 0, 0)),
                pl.BlockSpec((1, H), lambda b: (0, 0)),
            ],
            out_specs=pl.BlockSpec((block_b, H), lambda b: (b, 0)),
        ),
        # Parallel batch axis shards across both TensorCores on v7x; raise the
        # scoped-VMEM limit past the 16/32 MiB defaults (still < 64 MiB
        # physical on v7x) so the padded double-buffered pipeline fits.
        compiler_params=pltpu.CompilerParams(
            dimension_semantics=("parallel",),
            vmem_limit_bytes=48 * 1024 * 1024,
        ),
        cost_estimate=cost,
    )(x, a_row)
    return out


def _reference(x, a):
    scores = jnp.squeeze(jnp.matmul(x, a), axis=-1)    # (B, T)
    w = jax.nn.softmax(scores, axis=1)[..., None]      # (B, T, 1)
    return jnp.sum(x * w, axis=1)                      # (B, H)


if __name__ == "__main__":
    B, T, H = 2, 8, 32  # attention_size = 32

    key = jax.random.PRNGKey(0)
    kx, ka = jax.random.split(key)

    x = jax.random.normal(kx, (B, T, H), dtype=jnp.float32)

    # Xavier-normal init for the (H, 1) attention vector:
    # std = gain * sqrt(2 / (fan_in + fan_out)), gain = 1
    std = (2.0 / (H + 1)) ** 0.5
    attention_vec = std * jax.random.normal(ka, (H, 1), dtype=jnp.float32)

    fwd = jax.jit(attention_forward)
    out = fwd(x, attention_vec)
    out = jax.block_until_ready(out)

    ref = _reference(x, attention_vec)
    assert out.shape == (B, H)
    assert jnp.allclose(out, ref, atol=1e-5, rtol=1e-5)

    print("KERNEL_OK")
</pallas_src>

<mosaic_0001>
module attributes {stable_mosaic.version = 11 : i64} {
  func.func @_attention_kernel(%arg0: i32, %arg1: memref<2x8x32xf32, #tpu.memory_space<vmem>>, %arg2: memref<1x32xf32, #tpu.memory_space<vmem>>, %arg3: memref<2x32xf32, #tpu.memory_space<vmem>>) attributes {dimension_semantics = [#tpu.dimension_semantics<parallel>], iteration_bounds = array<i64: 1>, scalar_prefetch = 0 : i64, scratch_operands = 0 : i64, tpu.core_type = #tpu.core_type<tc>, window_params = [{transform_indices = @transform_0, window_bounds = array<i64: 2, 8, 32>}, {pipeline_mode = #tpu.pipeline_mode<synchronous>, transform_indices = @transform_1, window_bounds = array<i64: 1, 32>}, {transform_indices = @transform_2, window_bounds = array<i64: 2, 32>}]} {
    %c0 = arith.constant 0 : index
    %c0_0 = arith.constant 0 : index
    %c0_1 = arith.constant 0 : index
    %0 = vector.load %arg1[%c0, %c0_0, %c0_1] : memref<2x8x32xf32, #tpu.memory_space<vmem>>, vector<2x8x32xf32>
    %c0_2 = arith.constant 0 : index
    %c0_3 = arith.constant 0 : index
    %1 = vector.load %arg2[%c0_2, %c0_3] : memref<1x32xf32, #tpu.memory_space<vmem>>, vector<1x32xf32>
    %2 = vector.shape_cast %1 : vector<1x32xf32> to vector<1x1x32xf32>
    %3 = vector.broadcast %2 : vector<1x1x32xf32> to vector<2x8x32xf32>
    %4 = arith.mulf %0, %3 : vector<2x8x32xf32>
    %cst = arith.constant dense<0.000000e+00> : vector<2x8xf32>
    %5 = vector.multi_reduction <add>, %4, %cst [2] : vector<2x8x32xf32> to vector<2x8xf32>
    %6 = vector.shape_cast %5 : vector<2x8xf32> to vector<2x8x1xf32>
    %cst_4 = arith.constant dense<0xFF800000> : vector<2x1xf32>
    %7 = vector.multi_reduction <maximumf>, %6, %cst_4 [1] : vector<2x8x1xf32> to vector<2x1xf32>
    %8 = vector.shape_cast %7 : vector<2x1xf32> to vector<2x1x1xf32>
    %9 = vector.broadcast %8 : vector<2x1x1xf32> to vector<2x8x1xf32>
    %10 = arith.subf %6, %9 : vector<2x8x1xf32>
    %11 = math.exp %10 : vector<2x8x1xf32>
    %cst_5 = arith.constant dense<0.000000e+00> : vector<2x1xf32>
    %12 = vector.multi_reduction <add>, %11, %cst_5 [1] : vector<2x8x1xf32> to vector<2x1xf32>
    %13 = vector.shape_cast %12 : vector<2x1xf32> to vector<2x1x1xf32>
    %14 = vector.broadcast %11 : vector<2x8x1xf32> to vector<2x8x32xf32>
    %15 = arith.mulf %14, %0 : vector<2x8x32xf32>
    %cst_6 = arith.constant dense<0.000000e+00> : vector<2x32xf32>
    %16 = vector.multi_reduction <add>, %15, %cst_6 [1] : vector<2x8x32xf32> to vector<2x32xf32>
    %17 = vector.shape_cast %13 : vector<2x1x1xf32> to vector<2x1xf32>
    %18 = vector.broadcast %17 : vector<2x1xf32> to vector<2x32xf32>
    %19 = arith.divf %16, %18 : vector<2x32xf32>
    %c0_7 = arith.constant 0 : index
    %c0_8 = arith.constant 0 : index
    %20 = vector.load %arg3[%c0_7, %c0_8] : memref<2x32xf32, #tpu.memory_space<vmem>>, vector<2x32xf32>
    tpu.vector_store %arg3[%c0_7, %c0_8], %19 {strides = array<i32>} : memref<2x32xf32, #tpu.memory_space<vmem>>, vector<2x32xf32>,
    return
  }
  func.func @transform_0(%arg0: i32) -> (i32, i32, i32) {
    %c0_i32 = arith.constant 0 : i32
    %c0_i32_0 = arith.constant 0 : i32
    %c0_i32_1 = arith.constant 0 : i32
    return %arg0, %c0_i32, %c0_i32_0 : i32, i32, i32
  }
  func.func @transform_1(%arg0: i32) -> (i32, i32) {
    %c0_i32 = arith.constant 0 : i32
    %c0_i32_0 = arith.constant 0 : i32
    %c0_i32_1 = arith.constant 0 : i32
    return %c0_i32, %c0_i32_0 : i32, i32
  }
  func.func @transform_2(%arg0: i32) -> (i32, i32) {
    %c0_i32 = arith.constant 0 : i32
    %c0_i32_0 = arith.constant 0 : i32
    return %arg0, %c0_i32 : i32, i32
  }
}

</mosaic_0001>

<bundles_post_ra>
// kernel: attention_forward.1
= control target key start
LH: loop header
LB: loop body
LE: loop exit
PB: predicated region body
PF: predicated region fallthrough
CT: control target
= control target key end

     0   :  { %7 = vsyncpa [#allocation3], 0  ;;  %s227_s0 = inlined_call_operand.hbm [shape: f32[2,8,32], index: 0, kind: input, shape index: {}]   ;;  %s228_s1 = inlined_call_operand.vmem [shape: f32[1,32], index: 1, kind: input, shape index: {}]   ;;  %s229_s2 = inlined_call_operand.hbm [shape: f32[2,32], index: 2, kind: output, shape index: {}]  }
   0x1   :  { %8 = vsyncpa [#allocation4], 0  ;;  %s177_s9 = smov [#allocation2]   ;;  %s129_s13 = scalar_lea.hbm %s227_s0, 256 }
   0x2   :  { %s14_s10 = sshll.u32 %s177_s9, 4  ;;  %p130_p0 = scmp.ne.s32.totalorder %s227_s0, %s129_s13  ;;  %s15_s10 = int_to_ptr.vmem [resolvable:$true] %s14_s10 }
   0x3   :  { %p133_p1 = scmp.lt.u32.totalorder %s129_s13, %s227_s0 }
   0x5   :  { %p135_p2 = pnand %p133_p1, %p130_p0 }
   0x7   :  { %138 = shalt.err (!%p135_p2)
}
   0x8   :  { %s139_s18 = scalar_lea.vmem %s15_s10, 256  ;;  %p144_p4 = scmp.lt.s32.totalorder %s15_s10, %s15_s10 }
   0x9   :  { %p140_p3 = scmp.ne.s32.totalorder %s15_s10, %s139_s18  ;;  %p145_p5 = scmp.lt.s32.totalorder %s139_s18, %s139_s18 }
   0xb   :  { %p146_p6 = por %p145_p5, %p144_p4 }
   0xd   :  { %p147_p7 = pnand %p146_p6, %p140_p3 }
   0xf   :  { %150 = shalt.err (!%p147_p7)
}
  0x10   :  { %s178_s19 = smov 128   ;;  %s179_s20 = smov 8  }
  0x11   :  { %20 = dma.hbm_to_vmem [thread:$0]  %s227_s0, 256, %s15_s10, [#allocation3], %s178_s19, %s178_s19, %s179_s20  }
  0x12   :  { %173 = dma.done.wait [#allocation3], 256  }
  0x13   :  { %174 = vsyncadd [#allocation3], 4294967040  ;;  %v26_v0 = vld [vmem:[#allocation2] sm:$0xff]  ;;  %vm37_vm0 = vcmask 261120   ;;  %v27_v2 = vld [vmem:[#allocation2 + $0x8] sm:$0xff]  ;;  %s180_s0 = smov [#allocation5]  }
  0x14   :  { %v116_v1 = vld [vmem:[%s228_s1] ss:$0 sm:$0xff]  ;;  %s107_s1 = sshll.u32 %s180_s0, 4  ;;  %vm96_vm1 = vcmask 1041409   ;;  %vm99_vm2 = vcmask 254976   ;;  %s108_s1 = int_to_ptr.vmem [resolvable:$true] %s107_s1 }
  0x15   :  { %v35_v3 = vmul.f32 %v116_v1, %v26_v0  ;;  %v36_v4 = vmul.f32 %v116_v1, %v27_v2  ;;  %s151_s25 = scalar_lea.vmem %s108_s1, 32  ;;  %p156_p9 = scmp.lt.s32.totalorder %s108_s1, %s108_s1 }
  0x16   :  { %p152_p8 = scmp.ne.s32.totalorder %s108_s1, %s151_s25  ;;  %p157_p10 = scmp.lt.s32.totalorder %s151_s25, %s151_s25 }
  0x17   :  { %v38_v5 = vsel %vm37_vm0, %v35_v3, 0.0  ;;  %v41_v6 = vsel %vm37_vm0, %v36_v4, 0.0 }
  0x18   :  { %39 = vadd.xlane.f32.xlu0 %v38_v5  ;;  %p158_p11 = por %p157_p10, %p156_p9 }
  0x1a   :  { %p159_p12 = pnand %p158_p11, %p152_p8 }
  0x1c   :  { %42 = vadd.xlane.f32.xlu0 %v41_v6 }
  0xa5   :  { %v40_v7 = vpop.xlane.xlu0 %39 }
  0xa6   :  { %v44_v8 = vrot.slane %v40_v7, 4 }
  0xa8   :  { %v45_v9 = vmax.f32 %v40_v7, %v44_v8 }
  0xa9   :  { %v43_v10 = vpop.xlane.xlu0 %42 }
  0xaa   :  { %v46_v11 = vrot.slane %v45_v9, 2  ;;  %v50_v12 = vrot.slane %v43_v10, 4 }
  0xac   :  { %v47_v13 = vmax.f32 %v45_v9, %v46_v11  ;;  %v51_v14 = vmax.f32 %v43_v10, %v50_v12 }
  0xae   :  { %v48_v15 = vrot.slane %v47_v13, 1  ;;  %v52_v16 = vrot.slane %v51_v14, 2 }
  0xb0   :  { %v49_v17 = vmax.f32 %v47_v13, %v48_v15  ;;  %v53_v18 = vmax.f32 %v51_v14, %v52_v16 }
  0xb2   :  { %v56_v19 = vsub.f32 %v40_v7, %v49_v17  ;;  %v54_v20 = vrot.slane %v53_v18, 1 }
  0xb4   :  { %v58_v21 = vmul.f32 1.442695, %v56_v19  ;;  %v55_v22 = vmax.f32 %v53_v18, %v54_v20 }
  0xb6   :  { %121 = vpow2.f32 %v58_v21  ;;  %v57_v23 = vsub.f32 %v43_v10, %v55_v22 }
  0xb8   :  { %v60_v24 = vmul.f32 1.442695, %v57_v23 }
  0xba   :  { %123 = vpow2.f32 %v60_v24 }
  0xc0   :  { %v122_v25 = vpop.eup %121 }
  0xc1   :  { %v62_v26 = vrot.slane %v122_v25, 4  ;;  %v74_v27 = vmul.f32 %v122_v25, %v26_v0 }
  0xc3   :  { %v63_v28 = vadd.f32 %v122_v25, %v62_v26  ;;  %v76_v29 = vsel %vm37_vm0, %v74_v27, 0.0 }
  0xc4   :  { %v124_v30 = vpop.eup %123  ;;  %v77_v34 = vrot.slane %v76_v29, 4 }
  0xc5   :  { %v64_v31 = vrot.slane %v63_v28, 2  ;;  %v68_v32 = vrot.slane %v124_v30, 4  ;;  %v75_v33 = vmul.f32 %v124_v30, %v27_v2 }
  0xc6   :  { %v78_v41 = vadd.f32 %v77_v34, %v76_v29 }
  0xc7   :  { %v65_v35 = vadd.f32 %v64_v31, %v63_v28  ;;  %v69_v36 = vadd.f32 %v124_v30, %v68_v32  ;;  %v83_v37 = vsel %vm37_vm0, %v75_v33, 0.0 }
  0xc8   :  { %v84_v38 = vrot.slane %v83_v37, 4  ;;  %v79_v46 = vrot.slane %v78_v41, 2 }
  0xc9   :  { %v66_v39 = vrot.slane %v65_v35, 1  ;;  %v70_v40 = vrot.slane %v69_v36, 2 }
  0xca   :  { %v85_v42 = vadd.f32 %v84_v38, %v83_v37  ;;  %v80_v49 = vadd.f32 %v79_v46, %v78_v41 }
  0xcb   :  { %v67_v43 = vadd.f32 %v66_v39, %v65_v35  ;;  %v71_v44 = vadd.f32 %v70_v40, %v69_v36 }
  0xcc   :  { %v86_v47 = vrot.slane %v85_v42, 2  ;;  %v81_v51 = vrot.slane %v80_v49, 1 }
  0xcd   :  { %v72_v45 = vrot.slane %v71_v44, 1  ;;  %125 = vrcp.f32 %v67_v43 }
  0xce   :  { %v87_v50 = vadd.f32 %v86_v47, %v85_v42  ;;  %v82_v54 = vadd.f32 %v81_v51, %v80_v49 }
  0xcf   :  { %v73_v48 = vadd.f32 %v72_v45, %v71_v44 }
  0xd0   :  { %v88_v52 = vrot.slane %v87_v50, 1 }
  0xd1   :  { %127 = vrcp.f32 %v73_v48 }
  0xd2   :  { %v89_v55 = vadd.f32 %v88_v52, %v87_v50 }
  0xd7   :  { %v126_v53 = vpop.eup %125 }
  0xd8   :  { %v91_v57 = vmul.f32 %v126_v53, %v82_v54 }
  0xdb   :  { %v128_v56 = vpop.eup %127 }
  0xdc   :  { %v93_v58 = vmul.f32 %v128_v56, %v89_v55 }
  0xde   :  { %v97_v59 = vsel %vm96_vm1, %v93_v58, %v91_v57 }
  0xdf   :  { %100 = vst.msk [vmem:[#allocation5] sm:$0x3] %vm99_vm2, %v97_v59 }
  0xe0   :  { %162 = shalt.err (!%p159_p12)
}
  0xe1   :  { %s163_s28 = scalar_lea.hbm %s229_s2, 32 }
  0xe2   :  { %p164_p13 = scmp.ne.s32.totalorder %s229_s2, %s163_s28  ;;  %p167_p0 = scmp.lt.u32.totalorder %s163_s28, %s229_s2 }
  0xe4   :  { %p169_p1 = pnand %p167_p0, %p164_p13 }
  0xe6   :  { %172 = shalt.err (!%p169_p1)
}
  0xe7   :  { %110 = dma.vmem_to_hbm [thread:$0]  %s108_s1, 32, %s229_s2, [#allocation4]  }
  0xe8   :  { %175 = dma.done.wait [#allocation4], 32  }
  0xe9   :  { %176 = vsyncadd [#allocation4], 4294967264 }
  0xea   :  { %114 = vsyncpa [#allocation3], 1 }
  0xeb   :  { %115 = vsyncpa [#allocation4], 1 }

</bundles_post_ra>
